<compile_context>
chip_gen: v7x
topology: tpu7x:2x2x1
jax: 0.10.0
libtpu: 0.0.40
codegen_flags: <defaults>
</compile_context>

<pallas_src>
import functools
import math

import jax
import jax.numpy as jnp
from jax import lax
from jax.experimental import pallas as pl
from jax.experimental.pallas import tpu as pltpu


def _round_up(x, m):
    return (x + m - 1) // m * m


# ---------------------------------------------------------------------------
# Kernel A: fused q/k/v pre-projection + MHA in-projection (one bf16 matmul).
# ---------------------------------------------------------------------------
def _qkv_proj_kernel(x_ref, w_ref, b_ref, o_ref):
    x = x_ref[...].astype(jnp.bfloat16)                     # bf16 MXU inputs
    y = jnp.dot(x, w_ref[...], preferred_element_type=jnp.float32) + b_ref[...]
    o_ref[...] = y.astype(o_ref.dtype)                      # lane-dense (tq, 3*HP) store


# ---------------------------------------------------------------------------
# Kernel B: attention (all heads in batched contractions) + LN + FFN + LN.
# ---------------------------------------------------------------------------
def _attn_ffn_kernel(head_dim, e_real, e_pad,
                     x_ref, q_ref, k_ref, v_ref,
                     wo_ref, bo_ref, g_ref, be_ref,
                     w1_ref, b1_ref, w2_ref, b2_ref,
                     o_ref):
    tq = x_ref.shape[0]
    x = x_ref[...]                                          # (tq, Ep) f32 residual path

    # ---- multi-head attention: heads batched on the MXU ----
    q = q_ref[...]                                          # (H, tq, Dp) bf16
    k = k_ref[...]                                          # (H, S,  Dp) bf16 (resident)
    v = v_ref[...]                                          # (H, S,  Dp) bf16 (resident)
    s = jnp.einsum("hqd,hkd->hqk", q, k,
                   preferred_element_type=jnp.float32)
    s = s * (1.0 / math.sqrt(head_dim))                     # scale uses the real head_dim
    s = s - jnp.max(s, axis=-1, keepdims=True)
    p = jnp.exp(s)
    p = p * pl.reciprocal(jnp.sum(p, axis=-1, keepdims=True), approx=True)  # EUP recip
    ctx = jnp.einsum("hqk,hkd->hqd", p.astype(jnp.bfloat16), v,
                     preferred_element_type=jnp.float32)    # (H, tq, Dp)
    # Out-projection folded per head (avoids a head-concat relayout), then head-sum.
    per_head = jnp.einsum("hqd,hde->hqe", ctx.astype(jnp.bfloat16), wo_ref[...],
                          preferred_element_type=jnp.float32)   # (H, tq, Ep)
    attn = jnp.sum(per_head, axis=0) + bo_ref[...]              # (tq, Ep)

    # ---- residual + shared LayerNorm (padding-aware) + FFN + residual + LN ----
    gamma = jnp.broadcast_to(g_ref[...], (tq, e_pad))       # hoisted, reused by both LNs
    beta = jnp.broadcast_to(be_ref[...], (tq, e_pad))
    col_ok = lax.broadcasted_iota(jnp.int32, (tq, e_pad), 1) < e_real
    inv_e = 1.0 / float(e_real)

    def layer_norm(t):                                      # eps matches nn.LayerNorm
        mu = jnp.sum(t, axis=-1, keepdims=True) * inv_e     # padded lanes are exact zeros
        d = t - mu
        dm = jnp.where(col_ok, d, 0.0)
        var = jnp.sum(dm * dm, axis=-1, keepdims=True) * inv_e
        return d * lax.rsqrt(var + 1e-5) * gamma + beta     # gamma/beta zero in pads

    a1 = layer_norm(x + attn)

    # PositionwiseFeedForward: w_2(dropout(relu(w_1(x)))); dropout = identity at eval
    h1 = jnp.dot(a1.astype(jnp.bfloat16), w1_ref[...],
                 preferred_element_type=jnp.float32) + b1_ref[...]
    h1 = jnp.maximum(h1, 0.0)
    ff = jnp.dot(h1.astype(jnp.bfloat16), w2_ref[...],
                 preferred_element_type=jnp.float32) + b2_ref[...]

    o_ref[...] = layer_norm(ff + a1).astype(o_ref.dtype)


# ---------------------------------------------------------------------------
# Wrapper
# ---------------------------------------------------------------------------
@functools.partial(jax.jit, static_argnames=("num_heads",))
def self_attention_block_single_sequence(seq1, params, *, num_heads):
    """seq1: (1, S, E) or (S, E); returns (S, E) float32."""
    (qw, qb, kw, kb, vw, vb,
     iqw, iqb, ikw, ikb, ivw, ivb,
     ow, ob, lng, lnb, w1, b1, w2, b2) = params

    x = jnp.squeeze(seq1)                                   # torch.squeeze(seq1)
    S, E = x.shape
    assert E % num_heads == 0
    D = E // num_heads
    FF = w1.shape[1]

    # ----- lane-dense padded geometry (E=32 -> 128, head_dim 8 -> 32, FF 64 -> 128) ----
    E_pad = _round_up(E, 128)
    Dp = _round_up(max(D, E_pad // num_heads), 8)
    HP = num_heads * Dp
    FF_pad = _round_up(FF, 128)
    # Query tile: multiple of 8 sublanes, capped at 256 rows; resident weights +
    # per-tile activations are far below the 64 MiB v7x VMEM, so the default
    # scoped-VMEM limit is sufficient (no vmem_limit_bytes override needed).
    tq = min(_round_up(S, 8), 256)
    S_pad = _round_up(S, tq)
    n_tiles = S_pad // tq

    f32, bf16 = jnp.float32, jnp.bfloat16

    # ----- fold the q/k/v pre-projections into the MHA in-projection (wrapper-side) ---
    def fuse(pw, pb, iw, ib):
        # (x @ pw + pb) @ iw + ib == x @ (pw @ iw) + (pb @ iw + ib)
        return pw @ iw, pb @ iw + ib

    wq, bq = fuse(qw, qb, iqw, iqb)
    wk, bk = fuse(kw, kb, ikw, ikb)
    wv, bv = fuse(vw, vb, ivw, ivb)

    def pad_head_proj(w, b):
        # (E, E) -> (E_pad, H*Dp): output columns head-major (h, d), zeros in pads.
        w3 = jnp.pad(w.reshape(E, num_heads, D),
                     ((0, E_pad - E), (0, 0), (0, Dp - D)))
        b3 = jnp.pad(b.reshape(1, num_heads, D),
                     ((0, 0), (0, 0), (0, Dp - D)))
        return w3.reshape(E_pad, HP), b3.reshape(1, HP)

    wq_p, bq_p = pad_head_proj(wq, bq)
    wk_p, bk_p = pad_head_proj(wk, bk)
    wv_p, bv_p = pad_head_proj(wv, bv)
    w_qkv = jnp.concatenate([wq_p, wk_p, wv_p], axis=1).astype(bf16)
    b_qkv = jnp.concatenate([bq_p, bk_p, bv_p], axis=1).astype(f32)

    wo3 = jnp.pad(ow.reshape(num_heads, D, E),
                  ((0, 0), (0, Dp - D), (0, E_pad - E))).astype(bf16)   # (H, Dp, Ep)
    bo_p = jnp.pad(ob, ((0, 0), (0, E_pad - E))).astype(f32)
    g_p = jnp.pad(lng, ((0, 0), (0, E_pad - E))).astype(f32)            # zero in pads
    be_p = jnp.pad(lnb, ((0, 0), (0, E_pad - E))).astype(f32)
    w1_p = jnp.pad(w1, ((0, E_pad - E), (0, FF_pad - FF))).astype(bf16)
    b1_p = jnp.pad(b1, ((0, 0), (0, FF_pad - FF))).astype(f32)
    w2_p = jnp.pad(w2, ((0, FF_pad - FF), (0, E_pad - E))).astype(bf16)
    b2_p = jnp.pad(b2, ((0, 0), (0, E_pad - E))).astype(f32)

    x_p = jnp.pad(x.astype(f32), ((0, S_pad - S), (0, E_pad - E)))

    # ----- kernel A: one fused projection for q/k/v, grid over row tiles --------------
    qkv = pl.pallas_call(
        _qkv_proj_kernel,
        out_shape=jax.ShapeDtypeStruct((S_pad, 3 * HP), bf16),
        grid_spec=pltpu.PrefetchScalarGridSpec(
            num_scalar_prefetch=0,
            grid=(n_tiles,),
            in_specs=[
                pl.BlockSpec((tq, E_pad), lambda i: (i, 0)),
                pl.BlockSpec((E_pad, 3 * HP), lambda i: (0, 0)),   # resident weights
                pl.BlockSpec((1, 3 * HP), lambda i: (0, 0)),
            ],
            out_specs=pl.BlockSpec((tq, 3 * HP), lambda i: (i, 0)),
        ),
        compiler_params=pltpu.CompilerParams(
            dimension_semantics=("parallel",)),
        cost_estimate=pl.CostEstimate(
            flops=2 * S_pad * E_pad * 3 * HP,
            transcendentals=0,
            bytes_accessed=S_pad * E_pad * 4 + E_pad * 3 * HP * 2 + S_pad * 3 * HP * 2),
    )(x_p, w_qkv, b_qkv)

    # Layout plumbing (wrapper-side, not compute): head-major (H, S, Dp) slabs so the
    # in-kernel attention is a plain batched contraction with no relayouts.
    qkv3 = qkv.reshape(S_pad, 3, num_heads, Dp)
    q_h = jnp.transpose(qkv3[:, 0], (1, 0, 2))              # (H, S_pad, Dp)
    k_h = jnp.transpose(qkv3[:, 1], (1, 0, 2))[:, :S]       # (H, S, Dp) real keys only
    v_h = jnp.transpose(qkv3[:, 2], (1, 0, 2))[:, :S]

    # ----- kernel B: attention + LN + FFN + LN, grid over query tiles -----------------
    # TODO(synk): for very long sequences, stream K/V tiles with an online softmax
    # instead of keeping K/V fully resident per query tile; and batch multiple
    # independent sequences into one call to amortize the per-call overhead.
    kernel = functools.partial(_attn_ffn_kernel, D, E, E_pad)
    flops_b = (4 * num_heads * S_pad * S * Dp               # QK^T + PV
               + 2 * S_pad * HP * E_pad                     # out-projection
               + 4 * S_pad * E_pad * FF_pad                 # FFN
               + 32 * S_pad * E_pad)                        # LN / softmax / residuals
    bytes_b = (2 * S_pad * E_pad * 4                        # x in + out
               + (S_pad + 2 * S) * HP * 2                   # q, k, v (bf16)
               + (HP * E_pad + E_pad * FF_pad + FF_pad * E_pad) * 2   # weights (bf16)
               + 6 * E_pad * 4)                             # biases / LN params

    out_p = pl.pallas_call(
        kernel,
        out_shape=jax.ShapeDtypeStruct((S_pad, E_pad), f32),
        grid_spec=pltpu.PrefetchScalarGridSpec(
            num_scalar_prefetch=0,
            grid=(n_tiles,),
            in_specs=[
                pl.BlockSpec((tq, E_pad), lambda i: (i, 0)),                # x tile
                pl.BlockSpec((num_heads, tq, Dp), lambda i: (0, i, 0)),     # q tile
                pl.BlockSpec((num_heads, S, Dp), lambda i: (0, 0, 0)),      # K resident
                pl.BlockSpec((num_heads, S, Dp), lambda i: (0, 0, 0)),      # V resident
                pl.BlockSpec((num_heads, Dp, E_pad), lambda i: (0, 0, 0)),  # Wo
                pl.BlockSpec((1, E_pad), lambda i: (0, 0)),                 # bo
                pl.BlockSpec((1, E_pad), lambda i: (0, 0)),                 # LN gamma
                pl.BlockSpec((1, E_pad), lambda i: (0, 0)),                 # LN beta
                pl.BlockSpec((E_pad, FF_pad), lambda i: (0, 0)),            # W1
                pl.BlockSpec((1, FF_pad), lambda i: (0, 0)),                # b1
                pl.BlockSpec((FF_pad, E_pad), lambda i: (0, 0)),            # W2
                pl.BlockSpec((1, E_pad), lambda i: (0, 0)),                 # b2
            ],
            out_specs=pl.BlockSpec((tq, E_pad), lambda i: (i, 0)),
        ),
        compiler_params=pltpu.CompilerParams(
            dimension_semantics=("parallel",)),             # both v7x TCs get tiles
        cost_estimate=pl.CostEstimate(
            flops=flops_b,
            transcendentals=num_heads * S_pad * S,
            bytes_accessed=bytes_b),
    )(x_p, q_h, k_h, v_h, wo3, bo_p, g_p, be_p, w1_p, b1_p, w2_p, b2_p)

    return out_p[:S, :E]


# ---------------------------------------------------------------------------
# Parameters and pure-JAX reference (for a correctness check)
# ---------------------------------------------------------------------------
def init_params(key, embed_dim, ff_dim):
    """Deterministic synthetic parameters (shapes follow the module __init__)."""
    def linear_params(k, d_in, d_out):
        kw, kb = jax.random.split(k)
        bound = 1.0 / (d_in ** 0.5)
        w = jax.random.uniform(kw, (d_in, d_out), jnp.float32, -bound, bound)
        b = jax.random.uniform(kb, (1, d_out), jnp.float32, -bound, bound)
        return w, b

    keys = jax.random.split(key, 9)
    qw, qb = linear_params(keys[0], embed_dim, embed_dim)     # self.q_w
    kw, kb = linear_params(keys[1], embed_dim, embed_dim)     # self.k_w
    vw, vb = linear_params(keys[2], embed_dim, embed_dim)     # self.v_w
    iqw, iqb = linear_params(keys[3], embed_dim, embed_dim)   # attn in_proj (q slice)
    ikw, ikb = linear_params(keys[4], embed_dim, embed_dim)   # attn in_proj (k slice)
    ivw, ivb = linear_params(keys[5], embed_dim, embed_dim)   # attn in_proj (v slice)
    ow, ob = linear_params(keys[6], embed_dim, embed_dim)     # attn out_proj
    lng = jnp.ones((1, embed_dim), jnp.float32)               # LayerNorm weight
    lnb = jnp.zeros((1, embed_dim), jnp.float32)              # LayerNorm bias
    w1, b1 = linear_params(keys[7], embed_dim, ff_dim)        # ff.w_1
    w2, b2 = linear_params(keys[8], ff_dim, embed_dim)        # ff.w_2

    return [qw, qb, kw, kb, vw, vb,
            iqw, iqb, ikw, ikb, ivw, ivb,
            ow, ob, lng, lnb,
            w1, b1, w2, b2]


def _reference(seq1, params, num_heads):
    (qw, qb, kw, kb, vw, vb,
     iqw, iqb, ikw, ikb, ivw, ivb,
     ow, ob, lng, lnb, w1, b1, w2, b2) = params
    x = jnp.squeeze(seq1).astype(jnp.float32)
    S, E = x.shape
    D = E // num_heads
    q = (x @ qw + qb) @ iqw + iqb
    k = (x @ kw + kb) @ ikw + ikb
    v = (x @ vw + vb) @ ivw + ivb
    qh = q.reshape(S, num_heads, D).transpose(1, 0, 2)
    kh = k.reshape(S, num_heads, D).transpose(1, 0, 2)
    vh = v.reshape(S, num_heads, D).transpose(1, 0, 2)
    s = jnp.einsum("hqd,hkd->hqk", qh, kh) / math.sqrt(D)
    p = jax.nn.softmax(s, axis=-1)
    attn = jnp.einsum("hqk,hkd->hqd", p, vh).transpose(1, 0, 2).reshape(S, E) @ ow + ob

    def ln(t):
        mu = jnp.mean(t, axis=-1, keepdims=True)
        var = jnp.mean((t - mu) ** 2, axis=-1, keepdims=True)
        return (t - mu) * lax.rsqrt(var + 1e-5) * lng + lnb

    a1 = ln(x + attn)
    ff = jnp.maximum(a1 @ w1 + b1, 0.0) @ w2 + b2
    return ln(ff + a1)


if __name__ == "__main__":
    EMBED_DIM = 32
    NUM_HEADS = 4
    FF_DIM = 64
    SEQ_LEN = 8

    key = jax.random.PRNGKey(0)
    k_x, k_p = jax.random.split(key)

    seq1 = jax.random.normal(k_x, (1, SEQ_LEN, EMBED_DIM), jnp.float32)
    params = init_params(k_p, EMBED_DIM, FF_DIM)

    out = self_attention_block_single_sequence(seq1, params, num_heads=NUM_HEADS)
    out = jax.block_until_ready(out)
    assert out.shape == (SEQ_LEN, EMBED_DIM)
    assert bool(jnp.all(jnp.isfinite(out)))

    # Correctness against a pure-JAX f32 reference (tolerance covers bf16 MXU inputs
    # and the EUP approx reciprocal).
    ref = _reference(seq1, params, NUM_HEADS)
    assert bool(jnp.allclose(out, ref, atol=5e-2, rtol=5e-2)), \
        float(jnp.max(jnp.abs(out - ref)))

    print("KERNEL_OK")
</pallas_src>

<mosaic_0001>
module attributes {stable_mosaic.version = 11 : i64} {
  func.func @_qkv_proj_kernel(%arg0: i32, %arg1: memref<8x128xf32, #tpu.memory_space<vmem>>, %arg2: memref<128x384xbf16, #tpu.memory_space<vmem>>, %arg3: memref<1x384xf32, #tpu.memory_space<vmem>>, %arg4: memref<8x384xbf16, #tpu.memory_space<vmem>>) attributes {dimension_semantics = [#tpu.dimension_semantics<parallel>], iteration_bounds = array<i64: 1>, scalar_prefetch = 0 : i64, scratch_operands = 0 : i64, tpu.core_type = #tpu.core_type<tc>, window_params = [{transform_indices = @transform_0, window_bounds = array<i64: 8, 128>}, {pipeline_mode = #tpu.pipeline_mode<synchronous>, transform_indices = @transform_1, window_bounds = array<i64: 128, 384>}, {pipeline_mode = #tpu.pipeline_mode<synchronous>, transform_indices = @transform_2, window_bounds = array<i64: 1, 384>}, {transform_indices = @transform_3, window_bounds = array<i64: 8, 384>}]} {
    %c0 = arith.constant 0 : index
    %c0_0 = arith.constant 0 : index
    %0 = vector.load %arg1[%c0, %c0_0] : memref<8x128xf32, #tpu.memory_space<vmem>>, vector<8x128xf32>
    %1 = arith.truncf %0 : vector<8x128xf32> to vector<8x128xbf16>
    %c0_1 = arith.constant 0 : index
    %c0_2 = arith.constant 0 : index
    %2 = vector.load %arg2[%c0_1, %c0_2] : memref<128x384xbf16, #tpu.memory_space<vmem>>, vector<128x384xbf16>
    %cst = arith.constant dense<0.000000e+00> : vector<8x384xf32>
    %3 = tpu.matmul %1, %2, %cst {dimension_numbers = #tpu.dot_dimension_numbers<[1], [0], [0], [1], [0, 0, 1, 1], [], []>} : vector<8x128xbf16>, vector<128x384xbf16>, vector<8x384xf32> -> vector<8x384xf32>
    %c0_3 = arith.constant 0 : index
    %c0_4 = arith.constant 0 : index
    %4 = vector.load %arg3[%c0_3, %c0_4] : memref<1x384xf32, #tpu.memory_space<vmem>>, vector<1x384xf32>
    %5 = vector.broadcast %4 : vector<1x384xf32> to vector<8x384xf32>
    %6 = arith.addf %3, %5 : vector<8x384xf32>
    %7 = arith.truncf %6 : vector<8x384xf32> to vector<8x384xbf16>
    %c0_5 = arith.constant 0 : index
    %c0_6 = arith.constant 0 : index
    %8 = vector.load %arg4[%c0_5, %c0_6] : memref<8x384xbf16, #tpu.memory_space<vmem>>, vector<8x384xbf16>
    tpu.vector_store %arg4[%c0_5, %c0_6], %7 {strides = array<i32>} : memref<8x384xbf16, #tpu.memory_space<vmem>>, vector<8x384xbf16>,
    return
  }
  func.func @transform_0(%arg0: i32) -> (i32, i32) {
    %c0_i32 = arith.constant 0 : i32
    %c0_i32_0 = arith.constant 0 : i32
    return %arg0, %c0_i32 : i32, i32
  }
  func.func @transform_1(%arg0: i32) -> (i32, i32) {
    %c0_i32 = arith.constant 0 : i32
    %c0_i32_0 = arith.constant 0 : i32
    %c0_i32_1 = arith.constant 0 : i32
    return %c0_i32, %c0_i32_0 : i32, i32
  }
  func.func @transform_2(%arg0: i32) -> (i32, i32) {
    %c0_i32 = arith.constant 0 : i32
    %c0_i32_0 = arith.constant 0 : i32
    %c0_i32_1 = arith.constant 0 : i32
    return %c0_i32, %c0_i32_0 : i32, i32
  }
  func.func @transform_3(%arg0: i32) -> (i32, i32) {
    %c0_i32 = arith.constant 0 : i32
    %c0_i32_0 = arith.constant 0 : i32
    return %arg0, %c0_i32 : i32, i32
  }
}

module attributes {stable_mosaic.version = 11 : i64} {
  func.func @_attn_ffn_kernel(%arg0: i32, %arg1: memref<8x128xf32, #tpu.memory_space<vmem>>, %arg2: memref<4x8x32xbf16, #tpu.memory_space<vmem>>, %arg3: memref<4x8x32xbf16, #tpu.memory_space<vmem>>, %arg4: memref<4x8x32xbf16, #tpu.memory_space<vmem>>, %arg5: memref<4x32x128xbf16, #tpu.memory_space<vmem>>, %arg6: memref<1x128xf32, #tpu.memory_space<vmem>>, %arg7: memref<1x128xf32, #tpu.memory_space<vmem>>, %arg8: memref<1x128xf32, #tpu.memory_space<vmem>>, %arg9: memref<128x128xbf16, #tpu.memory_space<vmem>>, %arg10: memref<1x128xf32, #tpu.memory_space<vmem>>, %arg11: memref<128x128xbf16, #tpu.memory_space<vmem>>, %arg12: memref<1x128xf32, #tpu.memory_space<vmem>>, %arg13: memref<8x128xf32, #tpu.memory_space<vmem>>) attributes {dimension_semantics = [#tpu.dimension_semantics<parallel>], iteration_bounds = array<i64: 1>, scalar_prefetch = 0 : i64, scratch_operands = 0 : i64, tpu.core_type = #tpu.core_type<tc>, window_params = [{transform_indices = @transform_0, window_bounds = array<i64: 8, 128>}, {transform_indices = @transform_1, window_bounds = array<i64: 4, 8, 32>}, {pipeline_mode = #tpu.pipeline_mode<synchronous>, transform_indices = @transform_2, window_bounds = array<i64: 4, 8, 32>}, {pipeline_mode = #tpu.pipeline_mode<synchronous>, transform_indices = @transform_3, window_bounds = array<i64: 4, 8, 32>}, {pipeline_mode = #tpu.pipeline_mode<synchronous>, transform_indices = @transform_4, window_bounds = array<i64: 4, 32, 128>}, {pipeline_mode = #tpu.pipeline_mode<synchronous>, transform_indices = @transform_5, window_bounds = array<i64: 1, 128>}, {pipeline_mode = #tpu.pipeline_mode<synchronous>, transform_indices = @transform_6, window_bounds = array<i64: 1, 128>}, {pipeline_mode = #tpu.pipeline_mode<synchronous>, transform_indices = @transform_7, window_bounds = array<i64: 1, 128>}, {pipeline_mode = #tpu.pipeline_mode<synchronous>, transform_indices = @transform_8, window_bounds = array<i64: 128, 128>}, {pipeline_mode = #tpu.pipeline_mode<synchronous>, transform_indices = @transform_9, window_bounds = array<i64: 1, 128>}, {pipeline_mode = #tpu.pipeline_mode<synchronous>, transform_indices = @transform_10, window_bounds = array<i64: 128, 128>}, {pipeline_mode = #tpu.pipeline_mode<synchronous>, transform_indices = @transform_11, window_bounds = array<i64: 1, 128>}, {transform_indices = @transform_12, window_bounds = array<i64: 8, 128>}]} {
    %c0 = arith.constant 0 : index
    %c0_0 = arith.constant 0 : index
    %0 = vector.load %arg1[%c0, %c0_0] : memref<8x128xf32, #tpu.memory_space<vmem>>, vector<8x128xf32>
    %c0_1 = arith.constant 0 : index
    %c0_2 = arith.constant 0 : index
    %c0_3 = arith.constant 0 : index
    %1 = vector.load %arg2[%c0_1, %c0_2, %c0_3] : memref<4x8x32xbf16, #tpu.memory_space<vmem>>, vector<4x8x32xbf16>
    %c0_4 = arith.constant 0 : index
    %c0_5 = arith.constant 0 : index
    %c0_6 = arith.constant 0 : index
    %2 = vector.load %arg3[%c0_4, %c0_5, %c0_6] : memref<4x8x32xbf16, #tpu.memory_space<vmem>>, vector<4x8x32xbf16>
    %c0_7 = arith.constant 0 : index
    %c0_8 = arith.constant 0 : index
    %c0_9 = arith.constant 0 : index
    %3 = vector.load %arg4[%c0_7, %c0_8, %c0_9] : memref<4x8x32xbf16, #tpu.memory_space<vmem>>, vector<4x8x32xbf16>
    "tpu.trace_start"() <{level = 10 : i32, message = "hqd,hkd->hqk"}> : () -> ()
    %cst = arith.constant dense<0.000000e+00> : vector<4x8x8xf32>
    %4 = tpu.matmul %1, %2, %cst {dimension_numbers = #tpu.dot_dimension_numbers<[2], [2], [1], [1], [0, 0, 0, 1, 1, 1], [0], [0]>} : vector<4x8x32xbf16>, vector<4x8x32xbf16>, vector<4x8x8xf32> -> vector<4x8x8xf32>
    "tpu.trace_stop"() : () -> ()
    %cst_10 = arith.constant 0.353553385 : f32
    %5 = vector.broadcast %cst_10 : f32 to vector<4x8x8xf32>
    %6 = arith.mulf %4, %5 : vector<4x8x8xf32>
    %cst_11 = arith.constant dense<0xFF800000> : vector<4x8xf32>
    %7 = vector.multi_reduction <maximumf>, %6, %cst_11 [2] : vector<4x8x8xf32> to vector<4x8xf32>
    %8 = vector.shape_cast %7 : vector<4x8xf32> to vector<4x8x1xf32>
    %9 = vector.broadcast %8 : vector<4x8x1xf32> to vector<4x8x8xf32>
    %10 = arith.subf %6, %9 : vector<4x8x8xf32>
    %11 = math.exp %10 : vector<4x8x8xf32>
    %cst_12 = arith.constant dense<0.000000e+00> : vector<4x8xf32>
    %12 = vector.multi_reduction <add>, %11, %cst_12 [2] : vector<4x8x8xf32> to vector<4x8xf32>
    %13 = vector.shape_cast %12 : vector<4x8xf32> to vector<4x8x1xf32>
    %14 = tpu.reciprocal %13 {approx = true} : vector<4x8x1xf32> -> vector<4x8x1xf32>
    %15 = vector.broadcast %14 : vector<4x8x1xf32> to vector<4x8x8xf32>
    %16 = arith.mulf %11, %15 : vector<4x8x8xf32>
    %17 = arith.truncf %16 : vector<4x8x8xf32> to vector<4x8x8xbf16>
    "tpu.trace_start"() <{level = 10 : i32, message = "hqk,hkd->hqd"}> : () -> ()
    %cst_13 = arith.constant dense<0.000000e+00> : vector<4x8x32xf32>
    %18 = tpu.matmul %17, %3, %cst_13 {dimension_numbers = #tpu.dot_dimension_numbers<[2], [1], [1], [2], [0, 0, 0, 1, 1, 2], [0], [0]>} : vector<4x8x8xbf16>, vector<4x8x32xbf16>, vector<4x8x32xf32> -> vector<4x8x32xf32>
    "tpu.trace_stop"() : () -> ()
    %19 = arith.truncf %18 : vector<4x8x32xf32> to vector<4x8x32xbf16>
    %c0_14 = arith.constant 0 : index
    %c0_15 = arith.constant 0 : index
    %c0_16 = arith.constant 0 : index
    %20 = vector.load %arg5[%c0_14, %c0_15, %c0_16] : memref<4x32x128xbf16, #tpu.memory_space<vmem>>, vector<4x32x128xbf16>
    "tpu.trace_start"() <{level = 10 : i32, message = "hqd,hde->hqe"}> : () -> ()
    %cst_17 = arith.constant dense<0.000000e+00> : vector<4x8x128xf32>
    %21 = tpu.matmul %19, %20, %cst_17 {dimension_numbers = #tpu.dot_dimension_numbers<[2], [1], [1], [2], [0, 0, 0, 1, 1, 2], [0], [0]>} : vector<4x8x32xbf16>, vector<4x32x128xbf16>, vector<4x8x128xf32> -> vector<4x8x128xf32>
    "tpu.trace_stop"() : () -> ()
    %cst_18 = arith.constant dense<0.000000e+00> : vector<8x128xf32>
    %22 = vector.multi_reduction <add>, %21, %cst_18 [0] : vector<4x8x128xf32> to vector<8x128xf32>
    %c0_19 = arith.constant 0 : index
    %c0_20 = arith.constant 0 : index
    %23 = vector.load %arg6[%c0_19, %c0_20] : memref<1x128xf32, #tpu.memory_space<vmem>>, vector<1x128xf32>
    %24 = vector.broadcast %23 : vector<1x128xf32> to vector<8x128xf32>
    %25 = arith.addf %22, %24 : vector<8x128xf32>
    %c0_21 = arith.constant 0 : index
    %c0_22 = arith.constant 0 : index
    %26 = vector.load %arg7[%c0_21, %c0_22] : memref<1x128xf32, #tpu.memory_space<vmem>>, vector<1x128xf32>
    %27 = vector.shape_cast %26 : vector<1x128xf32> to vector<1x128xf32>
    %28 = vector.broadcast %27 : vector<1x128xf32> to vector<8x128xf32>
    %c0_23 = arith.constant 0 : index
    %c0_24 = arith.constant 0 : index
    %29 = vector.load %arg8[%c0_23, %c0_24] : memref<1x128xf32, #tpu.memory_space<vmem>>, vector<1x128xf32>
    %30 = vector.shape_cast %29 : vector<1x128xf32> to vector<1x128xf32>
    %31 = vector.broadcast %30 : vector<1x128xf32> to vector<8x128xf32>
    %32 = tpu.iota {dimensions = array<i32: 1>} : vector<8x128xi32>
    %c32_i32 = arith.constant 32 : i32
    %33 = vector.broadcast %c32_i32 : i32 to vector<8x128xi32>
    %34 = arith.cmpi slt, %32, %33 : vector<8x128xi32>
    %35 = arith.addf %0, %25 : vector<8x128xf32>
    %cst_25 = arith.constant dense<0.000000e+00> : vector<8xf32>
    %36 = vector.multi_reduction <add>, %35, %cst_25 [1] : vector<8x128xf32> to vector<8xf32>
    %37 = vector.shape_cast %36 : vector<8xf32> to vector<8x1xf32>
    %cst_26 = arith.constant 3.125000e-02 : f32
    %38 = vector.broadcast %cst_26 : f32 to vector<8x1xf32>
    %39 = arith.mulf %37, %38 : vector<8x1xf32>
    %40 = vector.broadcast %39 : vector<8x1xf32> to vector<8x128xf32>
    %41 = arith.subf %35, %40 : vector<8x128xf32>
    %cst_27 = arith.constant 0.000000e+00 : f32
    %42 = vector.broadcast %cst_27 : f32 to vector<8x128xf32>
    %43 = arith.select %34, %41, %42 : vector<8x128xi1>, vector<8x128xf32>
    %44 = arith.mulf %43, %43 : vector<8x128xf32>
    %cst_28 = arith.constant dense<0.000000e+00> : vector<8xf32>
    %45 = vector.multi_reduction <add>, %44, %cst_28 [1] : vector<8x128xf32> to vector<8xf32>
    %46 = vector.shape_cast %45 : vector<8xf32> to vector<8x1xf32>
    %cst_29 = arith.constant 3.125000e-02 : f32
    %47 = vector.broadcast %cst_29 : f32 to vector<8x1xf32>
    %48 = arith.mulf %46, %47 : vector<8x1xf32>
    %cst_30 = arith.constant 9.99999974E-6 : f32
    %49 = vector.broadcast %cst_30 : f32 to vector<8x1xf32>
    %50 = arith.addf %48, %49 : vector<8x1xf32>
    %51 = math.rsqrt %50 : vector<8x1xf32>
    %52 = vector.broadcast %51 : vector<8x1xf32> to vector<8x128xf32>
    %53 = arith.mulf %41, %52 : vector<8x128xf32>
    %54 = arith.mulf %53, %28 : vector<8x128xf32>
    %55 = arith.addf %54, %31 : vector<8x128xf32>
    %56 = arith.truncf %55 : vector<8x128xf32> to vector<8x128xbf16>
    %c0_31 = arith.constant 0 : index
    %c0_32 = arith.constant 0 : index
    %57 = vector.load %arg9[%c0_31, %c0_32] : memref<128x128xbf16, #tpu.memory_space<vmem>>, vector<128x128xbf16>
    %cst_33 = arith.constant dense<0.000000e+00> : vector<8x128xf32>
    %58 = tpu.matmul %56, %57, %cst_33 {dimension_numbers = #tpu.dot_dimension_numbers<[1], [0], [0], [1], [0, 0, 1, 1], [], []>} : vector<8x128xbf16>, vector<128x128xbf16>, vector<8x128xf32> -> vector<8x128xf32>
    %c0_34 = arith.constant 0 : index
    %c0_35 = arith.constant 0 : index
    %59 = vector.load %arg10[%c0_34, %c0_35] : memref<1x128xf32, #tpu.memory_space<vmem>>, vector<1x128xf32>
    %60 = vector.broadcast %59 : vector<1x128xf32> to vector<8x128xf32>
    %61 = arith.addf %58, %60 : vector<8x128xf32>
    %cst_36 = arith.constant 0.000000e+00 : f32
    %62 = vector.broadcast %cst_36 : f32 to vector<8x128xf32>
    %63 = arith.maximumf %61, %62 : vector<8x128xf32>
    %64 = arith.truncf %63 : vector<8x128xf32> to vector<8x128xbf16>
    %c0_37 = arith.constant 0 : index
    %c0_38 = arith.constant 0 : index
    %65 = vector.load %arg11[%c0_37, %c0_38] : memref<128x128xbf16, #tpu.memory_space<vmem>>, vector<128x128xbf16>
    %cst_39 = arith.constant dense<0.000000e+00> : vector<8x128xf32>
    %66 = tpu.matmul %64, %65, %cst_39 {dimension_numbers = #tpu.dot_dimension_numbers<[1], [0], [0], [1], [0, 0, 1, 1], [], []>} : vector<8x128xbf16>, vector<128x128xbf16>, vector<8x128xf32> -> vector<8x128xf32>
    %c0_40 = arith.constant 0 : index
    %c0_41 = arith.constant 0 : index
    %67 = vector.load %arg12[%c0_40, %c0_41] : memref<1x128xf32, #tpu.memory_space<vmem>>, vector<1x128xf32>
    %68 = vector.broadcast %67 : vector<1x128xf32> to vector<8x128xf32>
    %69 = arith.addf %66, %68 : vector<8x128xf32>
    %70 = arith.addf %69, %55 : vector<8x128xf32>
    %cst_42 = arith.constant dense<0.000000e+00> : vector<8xf32>
    %71 = vector.multi_reduction <add>, %70, %cst_42 [1] : vector<8x128xf32> to vector<8xf32>
    %72 = vector.shape_cast %71 : vector<8xf32> to vector<8x1xf32>
    %cst_43 = arith.constant 3.125000e-02 : f32
    %73 = vector.broadcast %cst_43 : f32 to vector<8x1xf32>
    %74 = arith.mulf %72, %73 : vector<8x1xf32>
    %75 = vector.broadcast %74 : vector<8x1xf32> to vector<8x128xf32>
    %76 = arith.subf %70, %75 : vector<8x128xf32>
    %cst_44 = arith.constant 0.000000e+00 : f32
    %77 = vector.broadcast %cst_44 : f32 to vector<8x128xf32>
    %78 = arith.select %34, %76, %77 : vector<8x128xi1>, vector<8x128xf32>
    %79 = arith.mulf %78, %78 : vector<8x128xf32>
    %cst_45 = arith.constant dense<0.000000e+00> : vector<8xf32>
    %80 = vector.multi_reduction <add>, %79, %cst_45 [1] : vector<8x128xf32> to vector<8xf32>
    %81 = vector.shape_cast %80 : vector<8xf32> to vector<8x1xf32>
    %cst_46 = arith.constant 3.125000e-02 : f32
    %82 = vector.broadcast %cst_46 : f32 to vector<8x1xf32>
    %83 = arith.mulf %81, %82 : vector<8x1xf32>
    %cst_47 = arith.constant 9.99999974E-6 : f32
    %84 = vector.broadcast %cst_47 : f32 to vector<8x1xf32>
    %85 = arith.addf %83, %84 : vector<8x1xf32>
    %86 = math.rsqrt %85 : vector<8x1xf32>
    %87 = vector.broadcast %86 : vector<8x1xf32> to vector<8x128xf32>
    %88 = arith.mulf %76, %87 : vector<8x128xf32>
    %89 = arith.mulf %88, %28 : vector<8x128xf32>
    %90 = arith.addf %89, %31 : vector<8x128xf32>
    %c0_48 = arith.constant 0 : index
    %c0_49 = arith.constant 0 : index
    %91 = vector.load %arg13[%c0_48, %c0_49] : memref<8x128xf32, #tpu.memory_space<vmem>>, vector<8x128xf32>
    tpu.vector_store %arg13[%c0_48, %c0_49], %90 {strides = array<i32>} : memref<8x128xf32, #tpu.memory_space<vmem>>, vector<8x128xf32>,
    return
  }
  func.func @transform_0(%arg0: i32) -> (i32, i32) {
    %c0_i32 = arith.constant 0 : i32
    %c0_i32_0 = arith.constant 0 : i32
    return %arg0, %c0_i32 : i32, i32
  }
  func.func @transform_1(%arg0: i32) -> (i32, i32, i32) {
    %c0_i32 = arith.constant 0 : i32
    %c0_i32_0 = arith.constant 0 : i32
    %c0_i32_1 = arith.constant 0 : i32
    return %c0_i32, %arg0, %c0_i32_0 : i32, i32, i32
  }
  func.func @transform_2(%arg0: i32) -> (i32, i32, i32) {
    %c0_i32 = arith.constant 0 : i32
    %c0_i32_0 = arith.constant 0 : i32
    %c0_i32_1 = arith.constant 0 : i32
    %c0_i32_2 = arith.constant 0 : i32
    return %c0_i32, %c0_i32_0, %c0_i32_1 : i32, i32, i32
  }
  func.func @transform_3(%arg0: i32) -> (i32, i32, i32) {
    %c0_i32 = arith.constant 0 : i32
    %c0_i32_0 = arith.constant 0 : i32
    %c0_i32_1 = arith.constant 0 : i32
    %c0_i32_2 = arith.constant 0 : i32
    return %c0_i32, %c0_i32_0, %c0_i32_1 : i32, i32, i32
  }
  func.func @transform_4(%arg0: i32) -> (i32, i32, i32) {
    %c0_i32 = arith.constant 0 : i32
    %c0_i32_0 = arith.constant 0 : i32
    %c0_i32_1 = arith.constant 0 : i32
    %c0_i32_2 = arith.constant 0 : i32
    return %c0_i32, %c0_i32_0, %c0_i32_1 : i32, i32, i32
  }
  func.func @transform_5(%arg0: i32) -> (i32, i32) {
    %c0_i32 = arith.constant 0 : i32
    %c0_i32_0 = arith.constant 0 : i32
    %c0_i32_1 = arith.constant 0 : i32
    return %c0_i32, %c0_i32_0 : i32, i32
  }
  func.func @transform_6(%arg0: i32) -> (i32, i32) {
    %c0_i32 = arith.constant 0 : i32
    %c0_i32_0 = arith.constant 0 : i32
    %c0_i32_1 = arith.constant 0 : i32
    return %c0_i32, %c0_i32_0 : i32, i32
  }
  func.func @transform_7(%arg0: i32) -> (i32, i32) {
    %c0_i32 = arith.constant 0 : i32
    %c0_i32_0 = arith.constant 0 : i32
    %c0_i32_1 = arith.constant 0 : i32
    return %c0_i32, %c0_i32_0 : i32, i32
  }
  func.func @transform_8(%arg0: i32) -> (i32, i32) {
    %c0_i32 = arith.constant 0 : i32
    %c0_i32_0 = arith.constant 0 : i32
    %c0_i32_1 = arith.constant 0 : i32
    return %c0_i32, %c0_i32_0 : i32, i32
  }
  func.func @transform_9(%arg0: i32) -> (i32, i32) {
    %c0_i32 = arith.constant 0 : i32
    %c0_i32_0 = arith.constant 0 : i32
    %c0_i32_1 = arith.constant 0 : i32
    return %c0_i32, %c0_i32_0 : i32, i32
  }
  func.func @transform_10(%arg0: i32) -> (i32, i32) {
    %c0_i32 = arith.constant 0 : i32
    %c0_i32_0 = arith.constant 0 : i32
    %c0_i32_1 = arith.constant 0 : i32
    return %c0_i32, %c0_i32_0 : i32, i32
  }
  func.func @transform_11(%arg0: i32) -> (i32, i32) {
    %c0_i32 = arith.constant 0 : i32
    %c0_i32_0 = arith.constant 0 : i32
    %c0_i32_1 = arith.constant 0 : i32
    return %c0_i32, %c0_i32_0 : i32, i32
  }
  func.func @transform_12(%arg0: i32) -> (i32, i32) {
    %c0_i32 = arith.constant 0 : i32
    %c0_i32_0 = arith.constant 0 : i32
    return %arg0, %c0_i32 : i32, i32
  }
}

</mosaic_0001>

<bundles_post_ra>
// kernel: self_attention_block_single_sequence.2
= control target key start
LH: loop header
LB: loop body
LE: loop exit
PB: predicated region body
PF: predicated region fallthrough
CT: control target
= control target key end

     0   :  { %v386_v0 = vmov 0.0   ;;  %vm387_vm0 = vmmov 0   ;;  %v388_v3 = vmov 0   ;;  %v51_v28 = vlaneseq  ;;  %s493_s1 = inlined_call_operand.vmem [shape: bf16[128,384], index: 1, kind: input, shape index: {}]   ;;  %s494_s0 = inlined_call_operand.vmem [shape: f32[8,128], index: 0, kind: input, shape index: {}]   ;;  %s495_s2 = inlined_call_operand.vmem [shape: f32[1,384], index: 2, kind: input, shape index: {}]   ;;  %s496_s3 = inlined_call_operand.vmem [shape: bf16[8,384], index: 3, kind: output, shape index: {}]  }
   0x1   :  { %331 = vmatprep.subr.bf16.mxu1 %v386_v0  ;;  %v354_v1 = vld [vmem:[%s493_s1 + $0x4] ss:$12 sps:$4 sm:$0xff]   ;;  %347 = vmatprep.mubr.msk.bf16.mxu1 %vm387_vm0, %v386_v0  ;;  %v356_v2 = vld [vmem:[%s493_s1 + $0x8] ss:$12 sps:$4 sm:$0xff]   ;;  %v357_v4 = vld [vmem:[%s493_s1] ss:$12 sps:$4 sm:$0xff]  }
   0x2   :  { %226 = vmatprep.mubr.bf16.mxu0 %v388_v3  ;;  %194 = vmatprep.subr.bf16.mxu0 %v354_v1  ;;  %v358_v5 = vld [vmem:[%s493_s1 + $0x1c] ss:$12 sps:$4 sm:$0xff]   ;;  %v360_v6 = vld [vmem:[%s493_s1 + $0x20] ss:$12 sps:$4 sm:$0xff]   ;;  %v361_v7 = vld [vmem:[%s493_s1 + $0x18] ss:$12 sps:$4 sm:$0xff]  }
   0x3   :  { %332 = vmatpush3.bf16.msra.mxu1 %v356_v2  ;;  %195 = vmatpush1.bf16.msra.mxu0 %v357_v4  ;;  %v362_v8 = vld [vmem:[%s493_s1 + $0x34] ss:$12 sps:$4 sm:$0xff]   ;;  %v364_v9 = vld [vmem:[%s493_s1 + $0x38] ss:$12 sps:$4 sm:$0xff]   ;;  %v365_v10 = vld [vmem:[%s493_s1 + $0x30] ss:$12 sps:$4 sm:$0xff]  }
   0x4   :  { %333 = vmatprep.subr.bf16.mxu1 %v386_v0  ;;  %196 = vmatprep.subr.bf16.mxu0 %v358_v5  ;;  %v366_v11 = vld [vmem:[%s493_s1 + $0x4c] ss:$12 sps:$4 sm:$0xff]   ;;  %v368_v12 = vld [vmem:[%s493_s1 + $0x50] ss:$12 sps:$4 sm:$0xff]   ;;  %v369_v13 = vld [vmem:[%s493_s1 + $0x48] ss:$12 sps:$4 sm:$0xff]  }
   0x5   :  { %v370_v14 = vld [vmem:[%s493_s1 + $0x64] ss:$12 sps:$4 sm:$0xff]   ;;  %v372_v15 = vld [vmem:[%s493_s1 + $0x68] ss:$12 sps:$4 sm:$0xff]   ;;  %v373_v16 = vld [vmem:[%s493_s1 + $0x60] ss:$12 sps:$4 sm:$0xff]  }
   0x6   :  { %v374_v17 = vld [vmem:[%s493_s1 + $0x7c] ss:$12 sps:$4 sm:$0xff]   ;;  %v376_v18 = vld [vmem:[%s493_s1 + $0x80] ss:$12 sps:$4 sm:$0xff]   ;;  %v377_v19 = vld [vmem:[%s493_s1 + $0x78] ss:$12 sps:$4 sm:$0xff]  }
   0x7   :  { %334 = vmatpush3.bf16.msra.mxu1 %v360_v6  ;;  %197 = vmatpush1.bf16.msra.mxu0 %v361_v7  ;;  %v378_v20 = vld [vmem:[%s493_s1 + $0x94] ss:$12 sps:$4 sm:$0xff]   ;;  %v380_v21 = vld [vmem:[%s493_s1 + $0x98] ss:$12 sps:$4 sm:$0xff]   ;;  %v381_v22 = vld [vmem:[%s493_s1 + $0x90] ss:$12 sps:$4 sm:$0xff]  }
   0x8   :  { %335 = vmatprep.subr.bf16.mxu1 %v386_v0  ;;  %198 = vmatprep.subr.bf16.mxu0 %v362_v8  ;;  %v382_v23 = vld [vmem:[%s493_s1 + $0xac] ss:$12 sps:$4 sm:$0xff]   ;;  %v384_v24 = vld [vmem:[%s493_s1 + $0xb0] ss:$12 sps:$4 sm:$0xff]   ;;  %v15_v25 = vld [vmem:[%s494_s0] sm:$0xff]  ;;  %v52_v29 = vshrl.u32 %v51_v28, 7 }
   0x9   :  { %v385_v26 = vld [vmem:[%s493_s1 + $0xa8] ss:$12 sps:$4 sm:$0xff]   ;;  %v16_v27 = vpack.c.bf16 %v15_v25, %v15_v25  ;;  %v49_v31 = vld [vmem:[%s495_s2] sm:$0x7] }
   0xa   :  { %v61_v30 = vsub.s32 2, %v52_v29  ;;  %v53_v32 = vsub.s32 0, %v52_v29  ;;  %v57_v33 = vsub.s32 1, %v52_v29 }
   0xb   :  { %336 = vmatpush3.bf16.msra.mxu1 %v364_v9  ;;  %199 = vmatpush1.bf16.msra.mxu0 %v365_v10 }
   0xc   :  { %337 = vmatprep.subr.bf16.mxu1 %v386_v0  ;;  %200 = vmatprep.subr.bf16.mxu0 %v366_v11  ;;  %v62_v34 = vrot.slane %v49_v31, %v61_v30  ;;  %v54_v35 = vrot.slane %v49_v31, %v53_v32  ;;  %v58_v36 = vrot.slane %v49_v31, %v57_v33 }
   0xf   :  { %338 = vmatpush3.bf16.msra.mxu1 %v368_v12  ;;  %201 = vmatpush1.bf16.msra.mxu0 %v369_v13 }
  0x10   :  { %339 = vmatprep.subr.bf16.mxu1 %v386_v0  ;;  %202 = vmatprep.subr.bf16.mxu0 %v370_v14 }
  0x13   :  { %340 = vmatpush3.bf16.msra.mxu1 %v372_v15  ;;  %203 = vmatpush1.bf16.msra.mxu0 %v373_v16 }
  0x14   :  { %341 = vmatprep.subr.bf16.mxu1 %v386_v0  ;;  %204 = vmatprep.subr.bf16.mxu0 %v374_v17 }
  0x17   :  { %342 = vmatpush3.bf16.msra.mxu1 %v376_v18  ;;  %205 = vmatpush1.bf16.msra.mxu0 %v377_v19 }
  0x18   :  { %343 = vmatprep.subr.bf16.mxu1 %v386_v0  ;;  %206 = vmatprep.subr.bf16.mxu0 %v378_v20 }
  0x1b   :  { %344 = vmatpush3.bf16.msra.mxu1 %v380_v21  ;;  %207 = vmatpush1.bf16.msra.mxu0 %v381_v22 }
  0x1c   :  { %345 = vmatprep.subr.bf16.mxu1 %v386_v0  ;;  %208 = vmatprep.subr.bf16.mxu0 %v382_v23 }
  0x1f   :  { %346 = vmatpush3.bf16.msra.mxu1 %v384_v24  ;;  %209 = vmatpush1.bf16.msra.mxu0 %v385_v26 }
  0x22   :  { %348 = vmatmul.mubr.bf16.vlgmr.msra.gmra.mrb[0].mxu1 %v16_v27  ;;  %227 = vmatmul.mubr.bf16.vlgmr.msra.gmra.mrb[0].mxu0 %v16_v27 }
  0xf5   :  { %v269_v37 = vpop.f32.mrb[0].mxu1  ;;  %v228_v39 = vpop.f32.mrb[0].mxu0 }
  0xf6   :  { %v270_v38 = vadd.f32 %v269_v37, %v62_v34  ;;  %v349_v40 = vpop.f32.mrb[1].mxu1  ;;  %v229_v41 = vadd.f32 %v228_v39, %v54_v35  ;;  %v230_v42 = vpop.f32.mrb[1].mxu0 }
  0xf7   :  { %v272_v43 = vpop.f32.mrb[2].mxu1  ;;  %v231_v45 = vadd.f32 %v230_v42, %v58_v36  ;;  %v232_v46 = vpop.f32.mrb[2].mxu0 }
  0xf8   :  { %v321_v44 = vpack.c.bf16 %v270_v38, %v270_v38  ;;  %v350_v47 = vpop.f32.mrb[3].mxu1  ;;  %v233_v48 = vpop.f32.mrb[3].mxu0 }
  0xf9   :  { %v320_v49 = vpack.c.bf16 %v231_v45, %v229_v41 }
  0xfa   :  { %289 = vst [vmem:[%s496_s3 + $0x8] sm:$0xf] %v321_v44 }
  0xfb   :  { %288 = vst [vmem:[%s496_s3] sm:$0xff] %v320_v49 }

// kernel: self_attention_block_single_sequence.3
= control target key start
LH: loop header
LB: loop body
LE: loop exit
PB: predicated region body
PF: predicated region fallthrough
CT: control target
= control target key end

     0   :  { %vm56_vm0 = vcmask 261120   ;;  %v1295_v2 = vmov 0.0   ;;  %vm1296_vm1 = vmmov 0   ;;  %s1596_s0 = inlined_call_operand.vmem [shape: f32[8,128], index: 0, kind: input, shape index: {}]   ;;  %s1597_s1 = inlined_call_operand.vmem [shape: bf16[4,8,32], index: 1, kind: input, shape index: {}]   ;;  %s1598_s2 = inlined_call_operand.vmem [shape: bf16[4,8,32], index: 2, kind: input, shape index: {}]   ;;  %s1599_s3 = inlined_call_operand.vmem [shape: bf16[4,8,32], index: 3, kind: input, shape index: {}]   ;;  %s1600_s4 = inlined_call_operand.vmem [shape: bf16[4,32,128], index: 4, kind: input, shape index: {}]   ;;  %s1601_s5 = inlined_call_operand.vmem [shape: f32[1,128], index: 5, kind: input, shape index: {}]   ;;  %s1602_s6 = inlined_call_operand.vmem [shape: f32[1,128], index: 6, kind: input, shape index: {}]   ;;  %s1603_s7 = inlined_call_operand.vmem [shape: f32[1,128], index: 7, kind: input, shape index: {}]   ;;  %s1604_s8 = inlined_call_operand.vmem [shape: bf16[128,128], index: 8, kind: input, shape index: {}]   ;;  %s1605_s9 = inlined_call_operand.vmem [shape: f32[1,128], index: 9, kind: input, shape index: {}]   ;;  %s1606_s10 = inlined_call_operand.vmem [shape: bf16[128,128], index: 10, kind: input, shape index: {}]   ;;  %s1607_s11 = inlined_call_operand.vmem [shape: f32[1,128], index: 11, kind: input, shape index: {}]   ;;  %s1608_s12 = inlined_call_operand.hbm [shape: f32[8,128], index: 12, kind: output, shape index: {}]  }
   0x1   :  { %v48_v0 = vld [vmem:[%s1598_s2] sm:$0xf]  ;;  %v49_v1 = vld [vmem:[%s1598_s2 + $0x4] sm:$0xf]  ;;  %1104 = vmatprep.subr.bf16.mxu0 %v1295_v2  ;;  %1110 = vmatprep.subr.bf16.mxu1 %v1295_v2  ;;  %v50_v5 = vld [vmem:[%s1598_s2 + $0x8] sm:$0xf] }
   0x2   :  { %v61_v3 = vsel %vm56_vm0, %v48_v0, 0  ;;  %v107_v4 = vsel %vm56_vm0, %v49_v1, 0  ;;  %v51_v6 = vld [vmem:[%s1598_s2 + $0xc] sm:$0xf]  ;;  %1106 = vmatprep.mubr.msk.bf16.mxu0 %vm1296_vm1, %v1295_v2  ;;  %v153_v7 = vsel %vm56_vm0, %v50_v5, 0  ;;  %1112 = vmatprep.mubr.msk.bf16.mxu1 %vm1296_vm1, %v1295_v2 }
   0x3   :  { %1105 = vmatpush3.bf16.xpose.msra.mxu0 %v61_v3  ;;  %1111 = vmatpush3.bf16.xpose.msra.mxu1 %v107_v4  ;;  %v199_v8 = vsel %vm56_vm0, %v51_v6, 0  ;;  %v44_v9 = vld [vmem:[%s1597_s1] sm:$0xf]  ;;  %v45_v10 = vld [vmem:[%s1597_s1 + $0x4] sm:$0xf] }
   0x4   :  { %1116 = vmatprep.subr.bf16.mxu0 %v1295_v2  ;;  %1122 = vmatprep.subr.bf16.mxu1 %v1295_v2  ;;  %v46_v11 = vld [vmem:[%s1597_s1 + $0x8] sm:$0xf]  ;;  %v47_v12 = vld [vmem:[%s1597_s1 + $0xc] sm:$0xf] }
   0xa   :  { %1107 = vmatmul.mubr.msk.bf16.vlgmr.msra.gmra.mrb[0].mxu0 %vm56_vm0, %v44_v9  ;;  %1113 = vmatmul.mubr.msk.bf16.vlgmr.msra.gmra.mrb[0].mxu1 %vm56_vm0, %v45_v10 }
   0xb   :  { %1117 = vmatpush3.bf16.xpose.msra.mxu0 %v153_v7  ;;  %1123 = vmatpush3.bf16.xpose.msra.mxu1 %v199_v8 }
   0xc   :  { %1118 = vmatprep.mubr.msk.bf16.mxu0 %vm1296_vm1, %v1295_v2  ;;  %1124 = vmatprep.mubr.msk.bf16.mxu1 %vm1296_vm1, %v1295_v2 }
   0xd   :  { %1128 = vmatprep.subr.bf16.mxu0 %v1295_v2  ;;  %1134 = vmatprep.subr.bf16.mxu1 %v1295_v2 }
  0x12   :  { %1119 = vmatmul.mubr.msk.bf16.vlgmr.msra.gmra.mrb[4].mxu0 %vm56_vm0, %v46_v11  ;;  %1125 = vmatmul.mubr.msk.bf16.vlgmr.msra.gmra.mrb[4].mxu1 %vm56_vm0, %v47_v12 }
  0x13   :  { %1130 = vmatprep.mubr.msk.bf16.mxu0 %vm1296_vm1, %v1295_v2  ;;  %1136 = vmatprep.mubr.msk.bf16.mxu1 %vm1296_vm1, %v1295_v2 }
  0x14   :  { %17 = vsyncpa [#allocation3], 0  ;;  %vm245_vm2 = vcmask 64512   ;;  %v52_v57 = vld [vmem:[%s1599_s3] sm:$0xf]  ;;  %vm297_vm3 = vcmask 1043456  }
  0x15   :  { %v299_v58 = vsel %vm297_vm3, %v52_v57, 0  ;;  %v53_v59 = vld [vmem:[%s1599_s3 + $0x4] sm:$0xf]  ;;  %v54_v1 = vld [vmem:[%s1599_s3 + $0x8] sm:$0xf] }
  0x16   :  { %1129 = vmatpush3.bf16.msra.mxu0 %v299_v58  ;;  %v345_v60 = vsel %vm297_vm3, %v53_v59, 0  ;;  %v391_v6 = vsel %vm297_vm3, %v54_v1, 0  ;;  %v55_v8 = vld [vmem:[%s1599_s3 + $0xc] sm:$0xf]  ;;  %v43_v1 = vld [vmem:[%s1596_s0] sm:$0xff] }
  0x17   :  { %1140 = vmatprep.subr.bf16.mxu0 %v1295_v2  ;;  %1135 = vmatpush3.bf16.msra.mxu1 %v345_v60  ;;  %v437_v11 = vsel %vm297_vm3, %v55_v8, 0  ;;  %v744_v8 = vlaneseq }
  0x18   :  { %1146 = vmatprep.subr.bf16.mxu1 %v1295_v2 }
  0xdd   :  { %v97_v13 = vpop.f32.mrb[0].mxu0  ;;  %v143_v14 = vpop.f32.mrb[0].mxu1 }
  0xde   :  { %v241_v15 = vmul.f32 0.35355338, %v97_v13  ;;  %v1108_v16 = vpop.f32.mrb[1].mxu0  ;;  %v242_v17 = vmul.f32 0.35355338, %v143_v14  ;;  %v1114_v18 = vpop.f32.mrb[1].mxu1 }
  0xdf   :  { %v100_v19 = vpop.f32.mrb[2].mxu0  ;;  %v146_v20 = vpop.f32.mrb[2].mxu1  ;;  %v1227_v14 = vld [vmem:[%s1600_s4] sm:$0xff]  }
  0xe0   :  { %v1109_v21 = vpop.f32.mrb[3].mxu0  ;;  %v246_v22 = vsel %vm245_vm2, %v241_v15, -inf  ;;  %v1115_v23 = vpop.f32.mrb[3].mxu1  ;;  %v249_v24 = vsel %vm245_vm2, %v242_v17, -inf  ;;  %v1228_v19 = vld [vmem:[%s1600_s4 + $0x8] sm:$0xff]   ;;  %v1229_v20 = vld [vmem:[%s1600_s4 + $0x10] sm:$0xff]  }
  0xe1   :  { %247 = vmax.xlane.f32.xlu0 %v246_v22  ;;  %v1230_v21 = vld [vmem:[%s1600_s4 + $0x18] sm:$0xff]   ;;  %v1231_v23 = vld [vmem:[%s1600_s4 + $0x20] sm:$0xff]  }
  0xe5   :  { %250 = vmax.xlane.f32.xlu0 %v249_v24  ;;  %v189_v25 = vpop.f32.mrb[4].mxu0  ;;  %v235_v26 = vpop.f32.mrb[4].mxu1 }
  0xe6   :  { %v243_v27 = vmul.f32 0.35355338, %v189_v25  ;;  %v1120_v28 = vpop.f32.mrb[5].mxu0  ;;  %v244_v29 = vmul.f32 0.35355338, %v235_v26  ;;  %v1126_v30 = vpop.f32.mrb[5].mxu1 }
  0xe7   :  { %v192_v31 = vpop.f32.mrb[6].mxu0  ;;  %v238_v32 = vpop.f32.mrb[6].mxu1  ;;  %v1233_v30 = vld [vmem:[%s1600_s4 + $0x30] sm:$0xff]  }
  0xe8   :  { %v1121_v33 = vpop.f32.mrb[7].mxu0  ;;  %v252_v34 = vsel %vm245_vm2, %v243_v27, -inf  ;;  %v1127_v35 = vpop.f32.mrb[7].mxu1  ;;  %v255_v36 = vsel %vm245_vm2, %v244_v29, -inf }
  0xe9   :  { %253 = vmax.xlane.f32.xlu1 %v252_v34 }
  0xed   :  { %256 = vmax.xlane.f32.xlu1 %v255_v36  ;;  %v1234_v36 = vld [vmem:[%s1600_s4 + $0x38] sm:$0xff]  }
 0x16e   :  { %v248_v37 = vpop.xlane.xlu0 %247 }
 0x16f   :  { %v258_v38 = vsub.f32 %v241_v15, %v248_v37 }
 0x171   :  { %v262_v39 = vmul.f32 1.442695, %v258_v38 }
 0x172   :  { %v251_v40 = vpop.xlane.xlu0 %250 }
 0x173   :  { %1251 = vpow2.f32 %v262_v39  ;;  %v259_v41 = vsub.f32 %v242_v17, %v251_v40 }
 0x175   :  { %v264_v42 = vmul.f32 1.442695, %v259_v41 }
 0x176   :  { %v254_v43 = vpop.xlane.xlu1 %253 }
 0x177   :  { %1253 = vpow2.f32 %v264_v42  ;;  %v260_v44 = vsub.f32 %v243_v27, %v254_v43 }
 0x179   :  { %v266_v45 = vmul.f32 1.442695, %v260_v44 }
 0x17a   :  { %v257_v46 = vpop.xlane.xlu1 %256 }
 0x17b   :  { %1255 = vpow2.f32 %v266_v45  ;;  %v261_v47 = vsub.f32 %v244_v29, %v257_v46  ;;  %v1232_v29 = vld [vmem:[%s1600_s4 + $0x28] sm:$0xff]  }
 0x17d   :  { %v1252_v48 = vpop.eup %1251  ;;  %v268_v49 = vmul.f32 1.442695, %v261_v47 }
 0x17e   :  { %v270_v50 = vsel %vm245_vm2, %v1252_v48, 0.0 }
 0x17f   :  { %1257 = vpow2.f32 %v268_v49  ;;  %271 = vadd.xlane.f32.xlu0 %v270_v50 }
 0x181   :  { %v1254_v51 = vpop.eup %1253 }
 0x182   :  { %v273_v52 = vsel %vm245_vm2, %v1254_v51, 0.0 }
 0x183   :  { %274 = vadd.xlane.f32.xlu1 %v273_v52 }
 0x185   :  { %v1256_v53 = vpop.eup %1255 }
 0x186   :  { %v276_v54 = vsel %vm245_vm2, %v1256_v53, 0.0 }
 0x187   :  { %277 = vadd.xlane.f32.xlu0 %v276_v54 }
 0x189   :  { %v1258_v55 = vpop.eup %1257 }
 0x18a   :  { %v279_v56 = vsel %vm245_vm2, %v1258_v55, 0.0 }
 0x18b   :  { %280 = vadd.xlane.f32.xlu1 %v279_v56 }
 0x20c   :  { %v272_v61 = vpop.xlane.xlu0 %271 }
 0x20d   :  { %1259 = vrcp.f32 %v272_v61  ;;  %v1037_v61 = vld [vmem:[%s1601_s5] ss:$0 sm:$0xff] }
 0x210   :  { %v275_v62 = vpop.xlane.xlu1 %274 }
 0x211   :  { %1261 = vrcp.f32 %v275_v62 }
 0x214   :  { %v278_v63 = vpop.xlane.xlu0 %277 }
 0x215   :  { %1263 = vrcp.f32 %v278_v63 }
 0x217   :  { %v1260_v0 = vpop.eup %1259 }
 0x218   :  { %v286_v3 = vmul.f32 %v1260_v0, %v1252_v48  ;;  %v281_v4 = vpop.xlane.xlu1 %280 }
 0x219   :  { %1265 = vrcp.f32 %v281_v4 }
 0x21a   :  { %v290_v5 = vpack.c.bf16 %v286_v3, %v286_v3 }
 0x21b   :  { %v1262_v7 = vpop.eup %1261 }
 0x21c   :  { %v287_v9 = vmul.f32 %v1262_v7, %v1254_v51  ;;  %1131 = vmatmul.mubr.msk.bf16.vlgmr.msra.gmra.mrb[8].mxu0 %vm245_vm2, %v290_v5  ;;  %v1236_v7 = vld [vmem:[%s1604_s8 + $0x8] sm:$0xff]  }
 0x21d   :  { %1141 = vmatpush3.bf16.msra.mxu0 %v391_v6  ;;  %1142 = vmatprep.mubr.msk.bf16.mxu0 %vm1296_vm1, %v1295_v2  ;;  %v1235_v6 = vld [vmem:[%s1604_s8] sm:$0xff]  }
 0x21e   :  { %v291_v10 = vpack.c.bf16 %v287_v9, %v287_v9  ;;  %1152 = vmatprep.subr.bf16.mxu0 %v1295_v2  ;;  %v1511_v9 = vand.u32 127, %v744_v8 }
 0x21f   :  { %v1264_v12 = vpop.eup %1263 }
 0x220   :  { %v288_v13 = vmul.f32 %v1264_v12, %v1256_v53  ;;  %1137 = vmatmul.mubr.msk.bf16.vlgmr.msra.gmra.mrb[8].mxu1 %vm245_vm2, %v291_v10  ;;  %vm746_vm4 = vcmp.lt.s32.totalorder %v1511_v9, 32 }
 0x221   :  { %1147 = vmatpush3.bf16.msra.mxu1 %v437_v11  ;;  %1148 = vmatprep.mubr.msk.bf16.mxu1 %vm1296_vm1, %v1295_v2 }
 0x222   :  { %v292_v15 = vpack.c.bf16 %v288_v13, %v288_v13  ;;  %1160 = vmatprep.subr.bf16.mxu1 %v1295_v2 }
 0x223   :  { %v1266_v16 = vpop.eup %1265 }
 0x224   :  { %v289_v17 = vmul.f32 %v1266_v16, %v1258_v55  ;;  %1143 = vmatmul.mubr.msk.bf16.vlgmr.msra.gmra.mrb[12].mxu0 %vm245_vm2, %v292_v15  ;;  %v1237_v15 = vld [vmem:[%s1604_s8 + $0x10] sm:$0xff]   ;;  %v1238_v16 = vld [vmem:[%s1604_s8 + $0x18] sm:$0xff]  }
 0x225   :  { %1153 = vmatpush3.bf16.msra.mxu0 %v1227_v14  ;;  %1156 = vmatprep.mubr.msk.bf16.mxu0 %vm1296_vm1, %v1295_v2 }
 0x226   :  { %v293_v18 = vpack.c.bf16 %v289_v17, %v289_v17  ;;  %1154 = vmatprep.subr.bf16.mxu0 %v1295_v2  ;;  %v1239_v17 = vld [vmem:[%s1604_s8 + $0x20] sm:$0xff]  }
 0x228   :  { %1149 = vmatmul.mubr.msk.bf16.vlgmr.msra.gmra.mrb[12].mxu1 %vm245_vm2, %v293_v18  ;;  %v1240_v18 = vld [vmem:[%s1604_s8 + $0x28] sm:$0xff]  }
 0x229   :  { %1164 = vmatprep.mubr.msk.bf16.mxu1 %vm1296_vm1, %v1295_v2  ;;  %1155 = vmatpush3.bf16.msra.mxu0 %v1228_v19  ;;  %v1241_v19 = vld [vmem:[%s1604_s8 + $0x30] sm:$0xff]  }
 0x22a   :  { %1161 = vmatpush3.bf16.msra.mxu1 %v1229_v20  ;;  %1168 = vmatprep.subr.bf16.mxu0 %v1295_v2  ;;  %v1242_v20 = vld [vmem:[%s1604_s8 + $0x38] sm:$0xff]  }
 0x22b   :  { %1162 = vmatprep.subr.bf16.mxu1 %v1295_v2 }
 0x22e   :  { %1163 = vmatpush3.bf16.msra.mxu1 %v1230_v21  ;;  %v1243_v21 = vld [vmem:[%s1606_s10] sm:$0xff]  }
 0x22f   :  { %1176 = vmatprep.subr.bf16.mxu1 %v1295_v2 }
 0x2ef   :  { %v335_v22 = vpop.f32.mrb[8].mxu0 }
 0x2f0   :  { %v479_v24 = vpack.c.bf16 %v335_v22, %v335_v22  ;;  %v1132_v25 = vpop.f32.mrb[9].mxu0  ;;  %v1244_v22 = vld [vmem:[%s1606_s10 + $0x8] sm:$0xff]  }
 0x2f1   :  { %v338_v26 = vpop.f32.mrb[10].mxu0  ;;  %v1247_v25 = vld [vmem:[%s1606_s10 + $0x20] sm:$0xff]  }
 0x2f2   :  { %v1133_v27 = vpop.f32.mrb[11].mxu0  ;;  %1157 = vmatmul.mubr.msk.bf16.vlgmr.msra.gmra.mrb[16].mxu0 %vm56_vm0, %v479_v24  ;;  %v1246_v24 = vld [vmem:[%s1606_s10 + $0x18] sm:$0xff]   ;;  %v1248_v26 = vld [vmem:[%s1606_s10 + $0x28] sm:$0xff]  }
 0x2f3   :  { %v381_v28 = vpop.f32.mrb[8].mxu1  ;;  %1169 = vmatpush3.bf16.msra.mxu0 %v1231_v23  ;;  %1172 = vmatprep.mubr.msk.bf16.mxu0 %vm1296_vm1, %v1295_v2  ;;  %v1245_v23 = vld [vmem:[%s1606_s10 + $0x10] sm:$0xff]  }
 0x2f4   :  { %v480_v31 = vpack.c.bf16 %v381_v28, %v381_v28  ;;  %v1138_v32 = vpop.f32.mrb[9].mxu1  ;;  %1170 = vmatprep.subr.bf16.mxu0 %v1295_v2 }
 0x2f5   :  { %v384_v33 = vpop.f32.mrb[10].mxu1 }
 0x2f6   :  { %v1139_v34 = vpop.f32.mrb[11].mxu1  ;;  %1165 = vmatmul.mubr.msk.bf16.vlgmr.msra.gmra.mrb[16].mxu1 %vm56_vm0, %v480_v31  ;;  %v1038_v31 = vld [vmem:[%s1602_s6] ss:$0 sm:$0xff] }
 0x2f7   :  { %v427_v35 = vpop.f32.mrb[12].mxu0  ;;  %1171 = vmatpush3.bf16.msra.mxu0 %v1232_v29  ;;  %1177 = vmatpush3.bf16.msra.mxu1 %v1233_v30  ;;  %v1039_v33 = vld [vmem:[%s1603_s7] ss:$0 sm:$0xff] }
 0x2f8   :  { %v481_v37 = vpack.c.bf16 %v427_v35, %v427_v35  ;;  %v1144_v38 = vpop.f32.mrb[13].mxu0  ;;  %1178 = vmatprep.subr.bf16.mxu1 %v1295_v2  ;;  %1180 = vmatprep.mubr.msk.bf16.mxu1 %vm1296_vm1, %v1295_v2 }
 0x2f9   :  { %v430_v39 = vpop.f32.mrb[14].mxu0  ;;  %1184 = vmatprep.subr.bf16.mxu0 %v1295_v2  ;;  %v1250_v38 = vld [vmem:[%s1606_s10 + $0x38] sm:$0xff]  }
 0x2fa   :  { %v1145_v40 = vpop.f32.mrb[15].mxu0  ;;  %1173 = vmatmul.mubr.msk.bf16.vlgmr.msra.gmra.mrb[20].mxu0 %vm56_vm0, %v481_v37  ;;  %v1249_v37 = vld [vmem:[%s1606_s10 + $0x30] sm:$0xff]   ;;  %v1040_v39 = vld [vmem:[%s1605_s9] ss:$0 sm:$0xff]  ;;  %s1297_s9 = smov [#allocation2]  }
 0x2fb   :  { %v473_v41 = vpop.f32.mrb[12].mxu1  ;;  %1179 = vmatpush3.bf16.msra.mxu1 %v1234_v36  ;;  %1200 = vmatprep.mubr.msk.bf16.mxu0 %vm1296_vm1, %v1295_v2  ;;  %s1009_s10 = sshll.u32 %s1297_s9, 4  ;;  %s1010_s10 = int_to_ptr.vmem [resolvable:$true] %s1009_s10 }
 0x2fc   :  { %v482_v42 = vpack.c.bf16 %v473_v41, %v473_v41  ;;  %v1150_v43 = vpop.f32.mrb[13].mxu1  ;;  %1204 = vmatprep.subr.bf16.mxu1 %v1295_v2  ;;  %1185 = vmatpush3.bf16.msra.mxu0 %v1235_v6  ;;  %p1276_p1 = scmp.lt.s32.totalorder %s1010_s10, %s1010_s10 }
 0x2fd   :  { %v476_v44 = vpop.f32.mrb[14].mxu1  ;;  %1186 = vmatprep.subr.bf16.mxu0 %v1295_v2 }
 0x2fe   :  { %v1151_v45 = vpop.f32.mrb[15].mxu1  ;;  %1181 = vmatmul.mubr.msk.bf16.vlgmr.msra.gmra.mrb[20].mxu1 %vm56_vm0, %v482_v42 }
 0x2ff   :  { %1220 = vmatprep.mubr.msk.bf16.mxu1 %vm1296_vm1, %v1295_v2  ;;  %1205 = vmatpush3.bf16.msra.mxu1 %v1243_v21 }
 0x300   :  { %1187 = vmatpush3.bf16.msra.mxu0 %v1236_v7  ;;  %1206 = vmatprep.subr.bf16.mxu1 %v1295_v2 }
 0x301   :  { %1188 = vmatprep.subr.bf16.mxu0 %v1295_v2 }
 0x303   :  { %1207 = vmatpush3.bf16.msra.mxu1 %v1244_v22 }
 0x304   :  { %1189 = vmatpush3.bf16.msra.mxu0 %v1237_v15  ;;  %1208 = vmatprep.subr.bf16.mxu1 %v1295_v2 }
 0x305   :  { %1190 = vmatprep.subr.bf16.mxu0 %v1295_v2 }
 0x307   :  { %1209 = vmatpush3.bf16.msra.mxu1 %v1245_v23 }
 0x308   :  { %1191 = vmatpush3.bf16.msra.mxu0 %v1238_v16  ;;  %1210 = vmatprep.subr.bf16.mxu1 %v1295_v2 }
 0x309   :  { %1192 = vmatprep.subr.bf16.mxu0 %v1295_v2 }
 0x30b   :  { %1211 = vmatpush3.bf16.msra.mxu1 %v1246_v24 }
 0x30c   :  { %1193 = vmatpush3.bf16.msra.mxu0 %v1239_v17  ;;  %1212 = vmatprep.subr.bf16.mxu1 %v1295_v2 }
 0x30d   :  { %1194 = vmatprep.subr.bf16.mxu0 %v1295_v2 }
 0x30f   :  { %1213 = vmatpush3.bf16.msra.mxu1 %v1247_v25 }
 0x310   :  { %1195 = vmatpush3.bf16.msra.mxu0 %v1240_v18  ;;  %1214 = vmatprep.subr.bf16.mxu1 %v1295_v2 }
 0x311   :  { %1196 = vmatprep.subr.bf16.mxu0 %v1295_v2 }
 0x313   :  { %1215 = vmatpush3.bf16.msra.mxu1 %v1248_v26 }
 0x314   :  { %1197 = vmatpush3.bf16.msra.mxu0 %v1241_v19  ;;  %1216 = vmatprep.subr.bf16.mxu1 %v1295_v2 }
 0x315   :  { %1198 = vmatprep.subr.bf16.mxu0 %v1295_v2 }
 0x317   :  { %1217 = vmatpush3.bf16.msra.mxu1 %v1249_v37 }
 0x318   :  { %1199 = vmatpush3.bf16.msra.mxu0 %v1242_v20  ;;  %1218 = vmatprep.subr.bf16.mxu1 %v1295_v2  ;;  %v1049_v2 = vld [vmem:[%s1607_s11] ss:$0 sm:$0xff]  ;;  %s1271_s11 = scalar_lea.vmem %s1010_s10, 128 }
 0x319   :  { %p1272_p0 = scmp.ne.s32.totalorder %s1010_s10, %s1271_s11  ;;  %p1277_p2 = scmp.lt.s32.totalorder %s1271_s11, %s1271_s11 }
 0x31b   :  { %1219 = vmatpush3.bf16.msra.mxu1 %v1250_v38  ;;  %p1278_p3 = por %p1277_p2, %p1276_p1 }
 0x31d   :  { %p1279_p4 = pnand %p1278_p3, %p1272_p0 }
 0x3c5   :  { %v548_v46 = vpop.f32.mrb[16].mxu0 }
 0x3c6   :  { %v1158_v47 = vpop.f32.mrb[17].mxu0 }
 0x3c7   :  { %v551_v48 = vpop.f32.mrb[18].mxu0 }
 0x3c8   :  { %v1159_v49 = vpop.f32.mrb[19].mxu0 }
 0x3c9   :  { %v603_v50 = vpop.f32.mrb[16].mxu1 }
 0x3ca   :  { %v719_v51 = vadd.f32 %v603_v50, %v548_v46  ;;  %v1166_v52 = vpop.f32.mrb[17].mxu1 }
 0x3cb   :  { %v606_v53 = vpop.f32.mrb[18].mxu1 }
 0x3cc   :  { %v1167_v54 = vpop.f32.mrb[19].mxu1 }
 0x3cd   :  { %v658_v55 = vpop.f32.mrb[20].mxu0 }
 0x3ce   :  { %v720_v56 = vadd.f32 %v719_v51, %v658_v55  ;;  %v1174_v57 = vpop.f32.mrb[21].mxu0 }
 0x3cf   :  { %v661_v58 = vpop.f32.mrb[22].mxu0 }
 0x3d0   :  { %v1175_v59 = vpop.f32.mrb[23].mxu0 }
 0x3d1   :  { %v713_v60 = vpop.f32.mrb[20].mxu1 }
 0x3d2   :  { %v721_v62 = vadd.f32 %v720_v56, %v713_v60  ;;  %v1182_v63 = vpop.f32.mrb[21].mxu1 }
 0x3d3   :  { %v716_v0 = vpop.f32.mrb[22].mxu1 }
 0x3d4   :  { %v729_v3 = vadd.f32 %v1037_v61, %v721_v62  ;;  %v1183_v4 = vpop.f32.mrb[23].mxu1 }
 0x3d6   :  { %v747_v5 = vadd.f32 %v729_v3, %v43_v1 }
 0x3d8   :  { %748 = vadd.xlane.f32.xlu0 %v747_v5 }
 0x465   :  { %v749_v10 = vpop.xlane.xlu0 %748 }
 0x466   :  { %v750_v11 = vmul.f32 0.03125, %v749_v10 }
 0x468   :  { %v751_v12 = vsub.f32 %v747_v5, %v750_v11 }
 0x46a   :  { %v752_v13 = vsel %vm746_vm4, %v751_v12, 0.0 }
 0x46b   :  { %v753_v14 = vmul.f32 %v752_v13, %v752_v13 }
 0x46d   :  { %754 = vadd.xlane.f32.xlu1 %v753_v14 }
 0x4fa   :  { %v755_v27 = vpop.xlane.xlu1 %754 }
 0x4fb   :  { %v756_v28 = vmul.f32 0.03125, %v755_v27 }
 0x4fd   :  { %v757_v29 = vadd.f32 1e-05, %v756_v28 }
 0x4ff   :  { %1267 = vrsqrt.f32 %v757_v29 }
 0x509   :  { %v1268_v30 = vpop.eup %1267 }
 0x50a   :  { %v759_v32 = vmul.f32 %v1268_v30, %v751_v12 }
 0x50c   :  { %v760_v34 = vmul.f32 %v1038_v31, %v759_v32 }
 0x50e   :  { %v761_v35 = vadd.f32 %v1039_v33, %v760_v34 }
 0x510   :  { %v762_v36 = vpack.c.bf16 %v761_v35, %v761_v35 }
 0x512   :  { %1201 = vmatmul.mubr.bf16.vlgmr.msra.gmra.mrb[24].mxu0 %v762_v36 }
 0x5e5   :  { %v868_v40 = vpop.f32.mrb[24].mxu0 }
 0x5e6   :  { %v869_v41 = vadd.f32 %v1040_v39, %v868_v40  ;;  %v1202_v42 = vpop.f32.mrb[25].mxu0 }
 0x5e7   :  { %v871_v43 = vpop.f32.mrb[26].mxu0 }
 0x5e8   :  { %v874_v44 = vmax.f32 %v869_v41, 0.0  ;;  %v1203_v45 = vpop.f32.mrb[27].mxu0 }
 0x5ea   :  { %v875_v46 = vpack.c.bf16 %v874_v44, %v874_v44 }
 0x5ec   :  { %1221 = vmatmul.mubr.bf16.vlgmr.msra.gmra.mrb[24].mxu1 %v875_v46 }
 0x6bf   :  { %v981_v47 = vpop.f32.mrb[24].mxu1 }
 0x6c0   :  { %v982_v48 = vadd.f32 %v1049_v2, %v981_v47  ;;  %v1222_v49 = vpop.f32.mrb[25].mxu1 }
 0x6c1   :  { %v984_v50 = vpop.f32.mrb[26].mxu1 }
 0x6c2   :  { %v1223_v51 = vpop.f32.mrb[27].mxu1  ;;  %v987_v52 = vadd.f32 %v982_v48, %v761_v35 }
 0x6c4   :  { %988 = vadd.xlane.f32.xlu0 %v987_v52 }
 0x751   :  { %v989_v53 = vpop.xlane.xlu0 %988 }
 0x752   :  { %v990_v54 = vmul.f32 0.03125, %v989_v53 }
 0x754   :  { %v991_v55 = vsub.f32 %v987_v52, %v990_v54 }
 0x756   :  { %v992_v56 = vsel %vm746_vm4, %v991_v55, 0.0 }
 0x757   :  { %v993_v57 = vmul.f32 %v992_v56, %v992_v56 }
 0x759   :  { %994 = vadd.xlane.f32.xlu1 %v993_v57 }
 0x7e6   :  { %v995_v58 = vpop.xlane.xlu1 %994 }
 0x7e7   :  { %v996_v59 = vmul.f32 0.03125, %v995_v58 }
 0x7e9   :  { %v997_v60 = vadd.f32 1e-05, %v996_v59 }
 0x7eb   :  { %1269 = vrsqrt.f32 %v997_v60 }
 0x7f5   :  { %v1270_v61 = vpop.eup %1269 }
 0x7f6   :  { %v999_v62 = vmul.f32 %v1270_v61, %v991_v55 }
 0x7f8   :  { %v1000_v63 = vmul.f32 %v1038_v31, %v999_v62 }
 0x7fa   :  { %v1001_v0 = vadd.f32 %v1039_v33, %v1000_v63 }
 0x7fc   :  { %1002 = vst [vmem:[#allocation2] sm:$0xff] %v1001_v0 }
 0x7fd   :  { %1282 = shalt.err (!%p1279_p4)
}
 0x7fe   :  { %s1283_s16 = scalar_lea.hbm %s1608_s12, 128 }
 0x7ff   :  { %p1284_p5 = scmp.ne.s32.totalorder %s1608_s12, %s1283_s16  ;;  %p1287_p6 = scmp.lt.u32.totalorder %s1283_s16, %s1608_s12 }
 0x801   :  { %p1289_p7 = pnand %p1287_p6, %p1284_p5 }
 0x803   :  { %1292 = shalt.err (!%p1289_p7)
}
 0x804   :  { %1012 = dma.vmem_to_hbm [thread:$0]  %s1010_s10, 128, %s1608_s12, [#allocation3]  }
 0x805   :  { %1293 = dma.done.wait [#allocation3], 128  }
 0x806   :  { %1294 = vsyncadd [#allocation3], 4294967168 }
 0x807   :  { %1016 = vsyncpa [#allocation3], 1 }

</bundles_post_ra>
